<compile_context>
chip_gen: v5e
topology: v5e:2x2
jax: 0.10.0
libtpu: 0.0.40
codegen_flags: <defaults>
</compile_context>

<pallas_src>
import functools

import numpy as np
import jax
import jax.numpy as jnp
from jax.experimental import pallas as pl
from jax.experimental.pallas import tpu as pltpu


NORM_TEMPERATURE = 50.0
USE_BIAS_VALUE = -4.6          # cfg USE_BIAS < 0  => bias enabled, init to this value
EPS = 1e-12                    # F.normalize eps


def _round_up(n, m):
    return ((n + m - 1) // m) * m


def _cdiv(a, b):
    return -(-a // b)


# ---------------------------------------------------------------------------
# Kernel
# ---------------------------------------------------------------------------
def prompt_classifier_kernel(x_ref, w_ref, b_ref, zs_ref, out_ref,
                             y_scr, s_scr, *, cls_bias, scale_logits):
    """Grid = (batch tiles [parallel], class tiles [arbitrary, innermost]).

    x_ref:   (TB, D_in[_p])  VMEM  f32/bf16 activation tile
    w_ref:   (D_in_p, D_p)   VMEM  bf16 linear weight (resident)
    b_ref:   (1, D_p)        VMEM  f32  linear bias   (resident)
    zs_ref:  (D_p, TN)       VMEM  bf16 class-embedding tile
    out_ref: (TB, TN)        VMEM  logits tile (bf16 by default)
    y_scr:   (TB, D_p)       VMEM  bf16 cached linear(+normalize) output
    s_scr:   (TB, 1)         VMEM  f32  cached per-row scale (only if scale_logits)
    """
    j = pl.program_id(1)

    # Linear + normalize only once per batch tile; reused across class tiles.
    @pl.when(j == 0)
    def _():
        # Linear on the MXU: bf16 x bf16 with f32 accumulation.
        y = jnp.dot(x_ref[...].astype(jnp.bfloat16), w_ref[...],
                    preferred_element_type=jnp.float32)
        y = y + b_ref[...]
        # temperature * L2-normalize along features (f32 VPU + one EUP rsqrt).
        # F.normalize clamps ||y|| at eps:  y / max(||y||, eps)
        #                                == y * rsqrt(max(||y||^2, eps^2))
        sumsq = jnp.sum(y * y, axis=1, keepdims=True)
        s = NORM_TEMPERATURE * jax.lax.rsqrt(jnp.maximum(sumsq, EPS * EPS))
        if scale_logits:          # apply the per-row scale on the narrower side:
            s_scr[...] = s        #   (s*y) @ Z == s * (y @ Z)
        else:
            y = y * s
        y_scr[...] = y.astype(jnp.bfloat16)

    # Cosine-similarity logits against this class tile (bf16 MXU, f32 acc).
    logits = jnp.dot(y_scr[...], zs_ref[...], preferred_element_type=jnp.float32)
    if scale_logits:
        logits = logits * s_scr[...]
    out_ref[...] = (logits + cls_bias).astype(out_ref.dtype)


# ---------------------------------------------------------------------------
# One-time parameter preparation (hoisted out of the per-call path)
# ---------------------------------------------------------------------------
def prepare_params(w_lin_t, b_lin, zs_weight, cls_bias):
    """Pad + cast the weights ONCE so forward calls never re-touch them in HBM."""
    D_in, D = w_lin_t.shape
    D2, C1 = zs_weight.shape
    assert D2 == D and b_lin.shape == (D,)

    d_in_p = _round_up(D_in, 128)
    d_p = _round_up(D, 128)
    c1_p = _round_up(C1, 128)

    w_p = jnp.zeros((d_in_p, d_p), jnp.bfloat16).at[:D_in, :D].set(
        w_lin_t.astype(jnp.bfloat16))
    b_p = jnp.zeros((1, d_p), jnp.float32).at[:, :D].set(
        b_lin.astype(jnp.float32)[None, :])
    zs_p = jnp.zeros((d_p, c1_p), jnp.bfloat16).at[:D, :C1].set(
        zs_weight.astype(jnp.bfloat16))

    return {
        "w_p": w_p, "b_p": b_p, "zs_p": zs_p,
        # compile-time scalar closed over the kernel (recompile if it ever changes)
        "cls_bias": float(jnp.asarray(cls_bias).reshape(())),
        "d_in": D_in, "d": D, "c1": C1,
    }


# ---------------------------------------------------------------------------
# Forward wrapper
# ---------------------------------------------------------------------------
def prompt_classifier_forward(x, params, *, batch_tile=None, class_tile=2048,
                              out_dtype=jnp.bfloat16):
    B, D_in = x.shape
    w_p, b_p, zs_p = params["w_p"], params["b_p"], params["zs_p"]
    d_in_p, d_p = w_p.shape
    c1_p = zs_p.shape[1]
    C1 = params["c1"]
    assert D_in == params["d_in"]

    # Activations: pad+cast in one pass only if D_in needs lane padding; otherwise
    # feed f32 straight from HBM and cast to bf16 on-chip (fewer HBM bytes).
    if D_in != d_in_p:
        x_in = jnp.zeros((B, d_in_p), jnp.bfloat16).at[:, :D_in].set(
            x.astype(jnp.bfloat16))
    else:
        x_in = x
    x_cols = x_in.shape[1]
    x_isz = x_in.dtype.itemsize
    out_isz = np.dtype(out_dtype).itemsize

    # Hardware budgets.
    try:
        vmem_cap = int(pltpu.get_tpu_info().vmem_capacity_bytes)
    except Exception:                      # pragma: no cover
        vmem_cap = 64 << 20                # conservative (v7x per-TC VMEM)
    if batch_tile is None:
        # v5e/v6e (128 MiB VMEM) afford 512-row tiles; v7x (64 MiB) stays at 256.
        batch_tile = 512 if vmem_cap >= (100 << 20) else 256

    # Batch tiling: balanced cdiv tiles (ragged last tile's writeback is masked by
    # Pallas), >= 2 tiles when possible so both v7x TensorCores get work.
    n_b_tiles = max(1, _cdiv(B, batch_tile))
    if B >= 16:
        n_b_tiles = max(n_b_tiles, 2)
    tb = min(_round_up(_cdiv(B, n_b_tiles), 8), _round_up(B, 8))
    grid_b = _cdiv(B, tb)

    # Class tiling (only kicks in for very large vocabularies).
    tn = min(c1_p, _round_up(class_tile, 128))
    grid_c = _cdiv(c1_p, tn)

    # VMEM sizing (conservatively assume double buffering everywhere).
    resident = 2 * (w_p.size * 2 + b_p.size * 4)

    def vmem_est(tb_, tn_):
        return (resident
                + 2 * tb_ * x_cols * x_isz           # x tiles
                + 2 * d_p * tn_ * 2                  # zs tiles
                + 2 * tb_ * tn_ * out_isz            # out tiles
                + tb_ * d_p * 2 + tb_ * 128 * 4)     # y / scale scratch

    budget = vmem_cap // 2
    while vmem_est(tb, tn) > budget and tb > 8:
        tb = max(8, _round_up(tb // 2, 8))
        grid_b = _cdiv(B, tb)
    while vmem_est(tb, tn) > budget and tn > 512:
        tn = max(512, _round_up(tn // 2, 128))
        grid_c = _cdiv(c1_p, tn)

    vmem_limit = int(min(vmem_cap * 3 // 4,
                         max(32 << 20, vmem_est(tb, tn) * 5 // 4)))

    grid = (grid_b, grid_c)
    scale_logits = c1_p < d_p            # multiply on whichever side is narrower

    kernel = functools.partial(prompt_classifier_kernel,
                               cls_bias=params["cls_bias"],
                               scale_logits=scale_logits)

    flops = 2 * B * d_in_p * d_p + 2 * B * d_p * c1_p
    bytes_accessed = (x_in.size * x_isz + w_p.size * 2 + b_p.size * 4
                      + zs_p.size * 2 + B * C1 * out_isz)

    def run(single_buffer_resident):
        def const_spec(shape, single):
            kw = {"pipeline_mode": pl.Buffered(1)} if single else {}
            return pl.BlockSpec(shape, lambda i, j: (0, 0), **kw)

        in_specs = [
            pl.BlockSpec((tb, x_cols), lambda i, j: (i, 0)),        # x tile
            const_spec((d_in_p, d_p), single_buffer_resident),      # W (resident)
            const_spec((1, d_p), single_buffer_resident),           # b (resident)
            (const_spec((d_p, tn), single_buffer_resident) if grid_c == 1
             else pl.BlockSpec((d_p, tn), lambda i, j: (0, j))),    # zs tile(s)
        ]
        # Output at its true (B, C+1) shape: the 128-multiple block keeps in-kernel
        # stores lane-dense, and Pallas clips the HBM writeback -> no post-slice.
        out_specs = pl.BlockSpec((tb, tn), lambda i, j: (i, j))
        return pl.pallas_call(
            kernel,
            out_shape=jax.ShapeDtypeStruct((B, C1), out_dtype),
            grid=grid,
            in_specs=in_specs,
            out_specs=out_specs,
            scratch_shapes=[pltpu.VMEM((tb, d_p), jnp.bfloat16),
                            pltpu.VMEM((tb, 1), jnp.float32)],
            compiler_params=pltpu.CompilerParams(
                dimension_semantics=("parallel", "arbitrary"),
                vmem_limit_bytes=vmem_limit),
            cost_estimate=pl.CostEstimate(flops=flops, transcendentals=B,
                                          bytes_accessed=bytes_accessed),
        )(x_in, w_p, b_p, zs_p)

    try:
        return run(single_buffer_resident=True)
    except Exception:  # pragma: no cover
        # TODO(synk): pipeline_mode=pl.Buffered(1) unsupported on this jax/Mosaic
        # version; fall back to default double-buffered resident weights.
        return run(single_buffer_resident=False)


# ---------------------------------------------------------------------------
# Deterministic synthetic parameters (no checkpoint / CLIP load)
# ---------------------------------------------------------------------------
def make_params(key, input_size, zs_weight_dim, num_classes):
    k_w, k_b, k_cls = jax.random.split(key, 3)

    # nn.Linear(input_size, zs_weight_dim): weight (D, D_in), bias (D,)
    w_lin = jax.random.normal(k_w, (zs_weight_dim, input_size), jnp.float32) * 0.02
    b_lin = jax.random.normal(k_b, (zs_weight_dim,), jnp.float32) * 0.01
    w_lin_t = w_lin.T  # (D_in, D) pre-transposed for the kernel

    # TODO(synk): class_embeddings come from CLIP.encode_text_with_prompt; no Pallas
    # equivalent — synthesize unit-normalized class embeddings + zero bg row instead.
    cls_emb = jax.random.normal(k_cls, (num_classes, zs_weight_dim), jnp.float32)
    cls_emb = cls_emb / jnp.maximum(
        jnp.linalg.norm(cls_emb, axis=1, keepdims=True), EPS)
    bg = jnp.zeros((1, zs_weight_dim), jnp.float32)
    class_embeddings = jnp.concatenate([cls_emb, bg], axis=0)   # (C+1, D)
    zs_weight = class_embeddings.T                               # (D, C+1)

    cls_bias = jnp.full((1,), USE_BIAS_VALUE, jnp.float32)
    return w_lin_t, b_lin, zs_weight, cls_bias


def reference_forward(x, w_lin_t, b_lin, zs_weight, cls_bias):
    y = x @ w_lin_t + b_lin
    n = jnp.sqrt(jnp.sum(y * y, axis=1, keepdims=True))
    y = NORM_TEMPERATURE * y / jnp.maximum(n, EPS)
    return y @ zs_weight + cls_bias[0]


if __name__ == "__main__":
    # Small shapes consistent with the module's forward: x is (B, D_in).
    B = 8
    D_IN = 64            # input_shape.channels (flattened ROI feature size)
    ZS_DIM = 128         # zs_weight_dim
    NUM_CLASSES = 15     # logits have NUM_CLASSES + 1 columns (bg)

    key = jax.random.PRNGKey(0)
    k_x, k_p = jax.random.split(key)
    x = jax.random.normal(k_x, (B, D_IN), jnp.float32)

    w_lin_t, b_lin, zs_weight, cls_bias = make_params(k_p, D_IN, ZS_DIM, NUM_CLASSES)
    params = prepare_params(w_lin_t, b_lin, zs_weight, cls_bias)   # once, at init

    out = prompt_classifier_forward(x, params)
    out = jax.block_until_ready(out)

    # Reference in f32 on bf16-rounded operands (the kernel feeds the MXU bf16 with
    # f32 accumulation and emits bf16 logits), isolating MXU / rsqrt / cast rounding.
    x_r = x.astype(jnp.bfloat16).astype(jnp.float32)
    w_r = w_lin_t.astype(jnp.bfloat16).astype(jnp.float32)
    zs_r = zs_weight.astype(jnp.bfloat16).astype(jnp.float32)
    ref = reference_forward(x_r, w_r, b_lin, zs_r, cls_bias)

    assert out.shape == (B, NUM_CLASSES + 1)
    assert out.dtype == jnp.bfloat16
    out_f32 = out.astype(jnp.float32)
    max_err = float(jnp.max(jnp.abs(out_f32 - ref)))
    assert jnp.allclose(out_f32, ref, atol=0.5, rtol=5e-2), f"max abs err {max_err}"

    print("KERNEL_OK")
</pallas_src>

<mosaic_0001>
module attributes {stable_mosaic.version = 11 : i64} {
  func.func @prompt_classifier_kernel(%arg0: i32, %arg1: i32, %arg2: memref<8x128xbf16, #tpu.memory_space<vmem>>, %arg3: memref<128x128xbf16, #tpu.memory_space<vmem>>, %arg4: memref<1x128xf32, #tpu.memory_space<vmem>>, %arg5: memref<128x128xbf16, #tpu.memory_space<vmem>>, %arg6: memref<8x128xbf16, #tpu.memory_space<vmem>>, %arg7: memref<8x128xbf16, #tpu.memory_space<vmem>>, %arg8: memref<8x1xf32, #tpu.memory_space<vmem>>) attributes {dimension_semantics = [#tpu.dimension_semantics<parallel>, #tpu.dimension_semantics<arbitrary>], iteration_bounds = array<i64: 1, 1>, scalar_prefetch = 0 : i64, scratch_operands = 2 : i64, tpu.core_type = #tpu.core_type<tc>, window_params = [{transform_indices = @transform_0, window_bounds = array<i64: 8, 128>}, {pipeline_mode = #tpu.pipeline_mode<synchronous>, transform_indices = @transform_1, window_bounds = array<i64: 128, 128>}, {pipeline_mode = #tpu.pipeline_mode<synchronous>, transform_indices = @transform_2, window_bounds = array<i64: 1, 128>}, {pipeline_mode = #tpu.pipeline_mode<synchronous>, transform_indices = @transform_3, window_bounds = array<i64: 128, 128>}, {transform_indices = @transform_4, window_bounds = array<i64: 8, 128>}]} {
    %c0_i32 = arith.constant 0 : i32
    %0 = arith.cmpi eq, %arg1, %c0_i32 : i32
    %1 = arith.extui %0 : i1 to i32
    %c0_i32_0 = arith.constant 0 : i32
    %2 = arith.cmpi ne, %1, %c0_i32_0 : i32
    scf.if %2 {
      %c0_7 = arith.constant 0 : index
      %c0_8 = arith.constant 0 : index
      %10 = vector.load %arg2[%c0_7, %c0_8] : memref<8x128xbf16, #tpu.memory_space<vmem>>, vector<8x128xbf16>
      %c0_9 = arith.constant 0 : index
      %c0_10 = arith.constant 0 : index
      %11 = vector.load %arg3[%c0_9, %c0_10] : memref<128x128xbf16, #tpu.memory_space<vmem>>, vector<128x128xbf16>
      %cst_11 = arith.constant dense<0.000000e+00> : vector<8x128xf32>
      %12 = tpu.matmul %10, %11, %cst_11 {dimension_numbers = #tpu.dot_dimension_numbers<[1], [0], [0], [1], [0, 0, 1, 1], [], []>} : vector<8x128xbf16>, vector<128x128xbf16>, vector<8x128xf32> -> vector<8x128xf32>
      %c0_12 = arith.constant 0 : index
      %c0_13 = arith.constant 0 : index
      %13 = vector.load %arg4[%c0_12, %c0_13] : memref<1x128xf32, #tpu.memory_space<vmem>>, vector<1x128xf32>
      %14 = vector.broadcast %13 : vector<1x128xf32> to vector<8x128xf32>
      %15 = arith.addf %12, %14 : vector<8x128xf32>
      %16 = arith.mulf %15, %15 : vector<8x128xf32>
      %cst_14 = arith.constant dense<0.000000e+00> : vector<8xf32>
      %17 = vector.multi_reduction <add>, %16, %cst_14 [1] : vector<8x128xf32> to vector<8xf32>
      %18 = vector.shape_cast %17 : vector<8xf32> to vector<8x1xf32>
      %cst_15 = arith.constant 1.000000e-24 : f32
      %19 = vector.broadcast %cst_15 : f32 to vector<8x1xf32>
      %20 = arith.maximumf %18, %19 : vector<8x1xf32>
      %21 = math.rsqrt %20 : vector<8x1xf32>
      %cst_16 = arith.constant 5.000000e+01 : f32
      %22 = vector.broadcast %cst_16 : f32 to vector<8x1xf32>
      %23 = arith.mulf %22, %21 : vector<8x1xf32>
      %24 = vector.broadcast %23 : vector<8x1xf32> to vector<8x128xf32>
      %25 = arith.mulf %15, %24 : vector<8x128xf32>
      %26 = arith.truncf %25 : vector<8x128xf32> to vector<8x128xbf16>
      %c0_17 = arith.constant 0 : index
      %c0_18 = arith.constant 0 : index
      %27 = vector.load %arg7[%c0_17, %c0_18] : memref<8x128xbf16, #tpu.memory_space<vmem>>, vector<8x128xbf16>
      tpu.vector_store %arg7[%c0_17, %c0_18], %26 {strides = array<i32>} : memref<8x128xbf16, #tpu.memory_space<vmem>>, vector<8x128xbf16>,
    } else {
    }
    %c0 = arith.constant 0 : index
    %c0_1 = arith.constant 0 : index
    %3 = vector.load %arg7[%c0, %c0_1] : memref<8x128xbf16, #tpu.memory_space<vmem>>, vector<8x128xbf16>
    %c0_2 = arith.constant 0 : index
    %c0_3 = arith.constant 0 : index
    %4 = vector.load %arg5[%c0_2, %c0_3] : memref<128x128xbf16, #tpu.memory_space<vmem>>, vector<128x128xbf16>
    %cst = arith.constant dense<0.000000e+00> : vector<8x128xf32>
    %5 = tpu.matmul %3, %4, %cst {dimension_numbers = #tpu.dot_dimension_numbers<[1], [0], [0], [1], [0, 0, 1, 1], [], []>} : vector<8x128xbf16>, vector<128x128xbf16>, vector<8x128xf32> -> vector<8x128xf32>
    %cst_4 = arith.constant -4.600000e+00 : f32
    %6 = vector.broadcast %cst_4 : f32 to vector<8x128xf32>
    %7 = arith.addf %5, %6 : vector<8x128xf32>
    %8 = arith.truncf %7 : vector<8x128xf32> to vector<8x128xbf16>
    %c0_5 = arith.constant 0 : index
    %c0_6 = arith.constant 0 : index
    %9 = vector.load %arg6[%c0_5, %c0_6] : memref<8x128xbf16, #tpu.memory_space<vmem>>, vector<8x128xbf16>
    tpu.vector_store %arg6[%c0_5, %c0_6], %8 {strides = array<i32>} : memref<8x128xbf16, #tpu.memory_space<vmem>>, vector<8x128xbf16>,
    return
  }
  func.func @transform_0(%arg0: i32, %arg1: i32) -> (i32, i32) {
    %c0_i32 = arith.constant 0 : i32
    %c0_i32_0 = arith.constant 0 : i32
    return %arg0, %c0_i32 : i32, i32
  }
  func.func @transform_1(%arg0: i32, %arg1: i32) -> (i32, i32) {
    %c0_i32 = arith.constant 0 : i32
    %c0_i32_0 = arith.constant 0 : i32
    %c0_i32_1 = arith.constant 0 : i32
    return %c0_i32, %c0_i32_0 : i32, i32
  }
  func.func @transform_2(%arg0: i32, %arg1: i32) -> (i32, i32) {
    %c0_i32 = arith.constant 0 : i32
    %c0_i32_0 = arith.constant 0 : i32
    %c0_i32_1 = arith.constant 0 : i32
    return %c0_i32, %c0_i32_0 : i32, i32
  }
  func.func @transform_3(%arg0: i32, %arg1: i32) -> (i32, i32) {
    %c0_i32 = arith.constant 0 : i32
    %c0_i32_0 = arith.constant 0 : i32
    %c0_i32_1 = arith.constant 0 : i32
    return %c0_i32, %c0_i32_0 : i32, i32
  }
  func.func @transform_4(%arg0: i32, %arg1: i32) -> (i32, i32) {
    %c0_i32 = arith.constant 0 : i32
    return %arg0, %arg1 : i32, i32
  }
}

module attributes {stable_mosaic.version = 11 : i64} {
  func.func @prompt_classifier_kernel(%arg0: i32, %arg1: i32, %arg2: memref<8x128xbf16, #tpu.memory_space<vmem>>, %arg3: memref<128x128xbf16, #tpu.memory_space<vmem>>, %arg4: memref<1x128xf32, #tpu.memory_space<vmem>>, %arg5: memref<128x128xbf16, #tpu.memory_space<vmem>>, %arg6: memref<8x128xbf16, #tpu.memory_space<vmem>>, %arg7: memref<8x128xbf16, #tpu.memory_space<vmem>>, %arg8: memref<8x1xf32, #tpu.memory_space<vmem>>) attributes {dimension_semantics = [#tpu.dimension_semantics<parallel>, #tpu.dimension_semantics<arbitrary>], iteration_bounds = array<i64: 1, 1>, scalar_prefetch = 0 : i64, scratch_operands = 2 : i64, tpu.core_type = #tpu.core_type<tc>, window_params = [{transform_indices = @transform_0, window_bounds = array<i64: 8, 128>}, {pipeline_mode = #tpu.pipeline_mode<synchronous>, transform_indices = @transform_1, window_bounds = array<i64: 128, 128>}, {pipeline_mode = #tpu.pipeline_mode<synchronous>, transform_indices = @transform_2, window_bounds = array<i64: 1, 128>}, {pipeline_mode = #tpu.pipeline_mode<synchronous>, transform_indices = @transform_3, window_bounds = array<i64: 128, 128>}, {transform_indices = @transform_4, window_bounds = array<i64: 8, 128>}]} {
    %c0_i32 = arith.constant 0 : i32
    %0 = arith.cmpi eq, %arg1, %c0_i32 : i32
    %1 = arith.extui %0 : i1 to i32
    %c0_i32_0 = arith.constant 0 : i32
    %2 = arith.cmpi ne, %1, %c0_i32_0 : i32
    scf.if %2 {
      %c0_7 = arith.constant 0 : index
      %c0_8 = arith.constant 0 : index
      %10 = vector.load %arg2[%c0_7, %c0_8] : memref<8x128xbf16, #tpu.memory_space<vmem>>, vector<8x128xbf16>
      %c0_9 = arith.constant 0 : index
      %c0_10 = arith.constant 0 : index
      %11 = vector.load %arg3[%c0_9, %c0_10] : memref<128x128xbf16, #tpu.memory_space<vmem>>, vector<128x128xbf16>
      %cst_11 = arith.constant dense<0.000000e+00> : vector<8x128xf32>
      %12 = tpu.matmul %10, %11, %cst_11 {dimension_numbers = #tpu.dot_dimension_numbers<[1], [0], [0], [1], [0, 0, 1, 1], [], []>} : vector<8x128xbf16>, vector<128x128xbf16>, vector<8x128xf32> -> vector<8x128xf32>
      %c0_12 = arith.constant 0 : index
      %c0_13 = arith.constant 0 : index
      %13 = vector.load %arg4[%c0_12, %c0_13] : memref<1x128xf32, #tpu.memory_space<vmem>>, vector<1x128xf32>
      %14 = vector.broadcast %13 : vector<1x128xf32> to vector<8x128xf32>
      %15 = arith.addf %12, %14 : vector<8x128xf32>
      %16 = arith.mulf %15, %15 : vector<8x128xf32>
      %cst_14 = arith.constant dense<0.000000e+00> : vector<8xf32>
      %17 = vector.multi_reduction <add>, %16, %cst_14 [1] : vector<8x128xf32> to vector<8xf32>
      %18 = vector.shape_cast %17 : vector<8xf32> to vector<8x1xf32>
      %cst_15 = arith.constant 1.000000e-24 : f32
      %19 = vector.broadcast %cst_15 : f32 to vector<8x1xf32>
      %20 = arith.maximumf %18, %19 : vector<8x1xf32>
      %21 = math.rsqrt %20 : vector<8x1xf32>
      %cst_16 = arith.constant 5.000000e+01 : f32
      %22 = vector.broadcast %cst_16 : f32 to vector<8x1xf32>
      %23 = arith.mulf %22, %21 : vector<8x1xf32>
      %24 = vector.broadcast %23 : vector<8x1xf32> to vector<8x128xf32>
      %25 = arith.mulf %15, %24 : vector<8x128xf32>
      %26 = arith.truncf %25 : vector<8x128xf32> to vector<8x128xbf16>
      %c0_17 = arith.constant 0 : index
      %c0_18 = arith.constant 0 : index
      %27 = vector.load %arg7[%c0_17, %c0_18] : memref<8x128xbf16, #tpu.memory_space<vmem>>, vector<8x128xbf16>
      tpu.vector_store %arg7[%c0_17, %c0_18], %26 {strides = array<i32>} : memref<8x128xbf16, #tpu.memory_space<vmem>>, vector<8x128xbf16>,
    } else {
    }
    %c0 = arith.constant 0 : index
    %c0_1 = arith.constant 0 : index
    %3 = vector.load %arg7[%c0, %c0_1] : memref<8x128xbf16, #tpu.memory_space<vmem>>, vector<8x128xbf16>
    %c0_2 = arith.constant 0 : index
    %c0_3 = arith.constant 0 : index
    %4 = vector.load %arg5[%c0_2, %c0_3] : memref<128x128xbf16, #tpu.memory_space<vmem>>, vector<128x128xbf16>
    %cst = arith.constant dense<0.000000e+00> : vector<8x128xf32>
    %5 = tpu.matmul %3, %4, %cst {dimension_numbers = #tpu.dot_dimension_numbers<[1], [0], [0], [1], [0, 0, 1, 1], [], []>} : vector<8x128xbf16>, vector<128x128xbf16>, vector<8x128xf32> -> vector<8x128xf32>
    %cst_4 = arith.constant -4.600000e+00 : f32
    %6 = vector.broadcast %cst_4 : f32 to vector<8x128xf32>
    %7 = arith.addf %5, %6 : vector<8x128xf32>
    %8 = arith.truncf %7 : vector<8x128xf32> to vector<8x128xbf16>
    %c0_5 = arith.constant 0 : index
    %c0_6 = arith.constant 0 : index
    %9 = vector.load %arg6[%c0_5, %c0_6] : memref<8x128xbf16, #tpu.memory_space<vmem>>, vector<8x128xbf16>
    tpu.vector_store %arg6[%c0_5, %c0_6], %8 {strides = array<i32>} : memref<8x128xbf16, #tpu.memory_space<vmem>>, vector<8x128xbf16>,
    return
  }
  func.func @transform_0(%arg0: i32, %arg1: i32) -> (i32, i32) {
    %c0_i32 = arith.constant 0 : i32
    %c0_i32_0 = arith.constant 0 : i32
    return %arg0, %c0_i32 : i32, i32
  }
  func.func @transform_1(%arg0: i32, %arg1: i32) -> (i32, i32) {
    %c0_i32 = arith.constant 0 : i32
    %c0_i32_0 = arith.constant 0 : i32
    %c0_i32_1 = arith.constant 0 : i32
    return %c0_i32, %c0_i32_0 : i32, i32
  }
  func.func @transform_2(%arg0: i32, %arg1: i32) -> (i32, i32) {
    %c0_i32 = arith.constant 0 : i32
    %c0_i32_0 = arith.constant 0 : i32
    %c0_i32_1 = arith.constant 0 : i32
    return %c0_i32, %c0_i32_0 : i32, i32
  }
  func.func @transform_3(%arg0: i32, %arg1: i32) -> (i32, i32) {
    %c0_i32 = arith.constant 0 : i32
    %c0_i32_0 = arith.constant 0 : i32
    %c0_i32_1 = arith.constant 0 : i32
    return %c0_i32, %c0_i32_0 : i32, i32
  }
  func.func @transform_4(%arg0: i32, %arg1: i32) -> (i32, i32) {
    %c0_i32 = arith.constant 0 : i32
    return %arg0, %arg1 : i32, i32
  }
}

</mosaic_0001>

<bundles_post_ra>
// kernel: tpu_custom_call.1
= control target key start
LH: loop header
LB: loop body
LE: loop exit
PB: predicated region body
PF: predicated region fallthrough
CT: control target
= control target key end

     0   :  { %9 = vsyncpa [#allocation5], 0  ;;  %s502_s0 = inlined_call_operand.hbm [shape: bf16[8,128], index: 0, kind: input, shape index: {}]   ;;  %s503_s1 = inlined_call_operand.hbm [shape: bf16[128,128], index: 1, kind: input, shape index: {}]   ;;  %s504_s2 = inlined_call_operand.vmem [shape: f32[1,128], index: 2, kind: input, shape index: {}]   ;;  %s505_s3 = inlined_call_operand.hbm [shape: bf16[128,128], index: 3, kind: input, shape index: {}]   ;;  %s506_s4 = inlined_call_operand.hbm [shape: bf16[8,16], index: 4, kind: output, shape index: {}]  }
   0x1   :  { %10 = vsyncpa [#allocation8], 0  ;;  %s27_s17 = sshll.u32 %s503_s1, 4  ;;  %s28_s17 = int_to_ptr.hbm [resolvable:$true] %s27_s17 }
   0x2   :  { %11 = vsyncpa [#allocation6], 0  ;;  %s456_s18 = smov [#allocation7]   ;;  %s17_s22 = sshll.u32 %s502_s0, 4  ;;  %s18_s22 = int_to_ptr.hbm [resolvable:$true] %s17_s22 }
   0x3   :  { %s29_s19 = sshll.u32 %s456_s18, 4  ;;  %s457_s23 = smov 64   ;;  %s30_s19 = int_to_ptr.vmem [resolvable:$true] %s29_s19 }
   0x4   :  { %s458_s24 = smov 4   ;;  %s459_s25 = smov [#allocation4]  }
   0x5   :  { %35 = dma.hbm_to_vmem [thread:$0]  %s28_s17, 1024, %s30_s19, [#allocation8], %s457_s23, %s457_s23, %s458_s24  }
   0x6   :  { %s19_s26 = sshll.u32 %s459_s25, 4  ;;  %s42_s29 = sshll.u32 %s505_s3, 4  ;;  %s20_s26 = int_to_ptr.vmem [resolvable:$true] %s19_s26  ;;  %s43_s29 = int_to_ptr.hbm [resolvable:$true] %s42_s29 }
   0x7   :  { %22 = dma.hbm_to_vmem [thread:$0]  %s18_s22, 64, %s20_s26, [#allocation5]  }
   0x8   :  { %s460_s1 = smov [#allocation9]  }
   0x9   :  { %s44_s30 = sshll.u32 %s460_s1, 4  ;;  %s45_s30 = int_to_ptr.vmem [resolvable:$true] %s44_s30 }
   0xa   :  { %50 = dma.hbm_to_vmem [thread:$0]  %s43_s29, 1024, %s45_s30, [#allocation8], %s457_s23, %s457_s23, %s458_s24  }
   0xb   :  { %450 = dma.done.wait [#allocation5], 64  }
   0xc   :  { %451 = vsyncadd [#allocation5], 4294967232 }
   0xd   :  { %452 = dma.done.wait [#allocation8], 2048  }
   0xe   :  { %453 = vsyncadd [#allocation8], 4294965248  ;;  %v336_v0 = vld [vmem:[#allocation7 + $0x38] sm:$0xff]  ;;  %v335_v1 = vld [vmem:[#allocation7 + $0x30] sm:$0xff]  ;;  %s254_s8 = sshll.u32 %s506_s4, 4  ;;  %s255_s8 = int_to_ptr.hbm [resolvable:$true] %s254_s8 }
   0xf   :  { %136 = vmatpush.bf16.msra.mxu0 %v336_v0  ;;  %v334_v2 = vld [vmem:[#allocation7 + $0x28] sm:$0xff]  ;;  %v333_v3 = vld [vmem:[#allocation7 + $0x20] sm:$0xff]  ;;  %v332_v4 = vld [vmem:[#allocation7 + $0x18] sm:$0xff] }
  0x10   :  { %v331_v5 = vld [vmem:[#allocation7 + $0x10] sm:$0xff]  ;;  %v330_v6 = vld [vmem:[#allocation7 + $0x8] sm:$0xff]  ;;  %v329_v7 = vld [vmem:[#allocation7] sm:$0xff] }
  0x11   :  { %v67_v8 = vld [vmem:[#allocation4] sm:$0xf]  ;;  %v351_v9 = vld [vmem:[%s504_s2] ss:$0 sm:$0xff]  ;;  %v343_v15 = vld [vmem:[#allocation9 + $0x30] sm:$0xff]  ;;  %s461_s2 = smov [#allocation10]  }
  0x12   :  { %v344_v14 = vld [vmem:[#allocation9 + $0x38] sm:$0xff]  ;;  %v342_v16 = vld [vmem:[#allocation9 + $0x28] sm:$0xff]  ;;  %v341_v17 = vld [vmem:[#allocation9 + $0x20] sm:$0xff]  ;;  %s252_s5 = sshll.u32 %s461_s2, 4  ;;  %s253_s5 = int_to_ptr.vmem [resolvable:$true] %s252_s5 }
  0x13   :  { %137 = vmatpush.bf16.msra.mxu0 %v335_v1  ;;  %232 = vmatpush.bf16.msra.mxu1 %v344_v14  ;;  %v340_v18 = vld [vmem:[#allocation9 + $0x18] sm:$0xff]  ;;  %v339_v19 = vld [vmem:[#allocation9 + $0x10] sm:$0xff]  ;;  %v338_v20 = vld [vmem:[#allocation9 + $0x8] sm:$0xff] }
  0x14   :  { %v337_v21 = vld [vmem:[#allocation9] sm:$0xff] }
  0x17   :  { %138 = vmatpush.bf16.msra.mxu0 %v334_v2  ;;  %233 = vmatpush.bf16.msra.mxu1 %v343_v15 }
  0x1b   :  { %139 = vmatpush.bf16.msra.mxu0 %v333_v3  ;;  %234 = vmatpush.bf16.msra.mxu1 %v342_v16 }
  0x1f   :  { %140 = vmatpush.bf16.msra.mxu0 %v332_v4  ;;  %235 = vmatpush.bf16.msra.mxu1 %v341_v17 }
  0x23   :  { %141 = vmatpush.bf16.msra.mxu0 %v331_v5  ;;  %236 = vmatpush.bf16.msra.mxu1 %v340_v18 }
  0x27   :  { %142 = vmatpush.bf16.msra.mxu0 %v330_v6  ;;  %237 = vmatpush.bf16.msra.mxu1 %v339_v19 }
  0x2b   :  { %143 = vmatpush.bf16.msra.mxu0 %v329_v7  ;;  %238 = vmatpush.bf16.msra.mxu1 %v338_v20 }
  0x2e   :  { %144 = vmatmul.bf16.vlgmr.msra.gmra.mxu0 %v67_v8 }
  0x2f   :  { %239 = vmatpush.bf16.msra.mxu1 %v337_v21 }
  0xab   :  { %v145_v10 = vpop.f32.mrf.mxu0 }
  0xac   :  { %v146_v11 = vadd.f32 %v351_v9, %v145_v10 }
  0xae   :  { %v149_v12 = vmul.f32 %v146_v11, %v146_v11 }
  0xb0   :  { %150 = vadd.xlane.f32.xlu0 %v149_v12 }
  0xb3   :  { %v147_v13 = vpop.f32.mrf.mxu0 }
 0x123   :  { %v151_v22 = vpop.xlane.xlu0 %150 }
 0x124   :  { %v152_v23 = vmax.f32 %v151_v22, 1e-24 }
 0x126   :  { %352 = vrsqrt.f32 %v152_v23  ;;  %vm159_vm1 = vweird.f32 %v152_v23 }
 0x12c   :  { %v353_v24 = vpop.eup %352 }
 0x12d   :  { %v154_v25 = vmul.f32 %v353_v24, %v152_v23  ;;  %vm160_vm0 = vweird.f32 %v353_v24 }
 0x12e   :  { %vm161_vm2 = vmor %vm159_vm1, %vm160_vm0 }
 0x12f   :  { %v155_v26 = vmul.f32 %v353_v24, %v154_v25 }
 0x131   :  { %v156_v27 = vmul.f32 0.5, %v155_v26 }
 0x133   :  { %v157_v28 = vsub.f32 1.5, %v156_v27 }
 0x135   :  { %v158_v29 = vmul.f32 %v353_v24, %v157_v28 }
 0x137   :  { %v162_v30 = vsel %vm161_vm2, %v353_v24, %v158_v29 }
 0x138   :  { %v163_v31 = vmul.f32 50.0, %v162_v30 }
 0x13a   :  { %v164_v32 = vmul.f32 %v163_v31, %v146_v11 }
 0x13c   :  { %v165_v33 = vpack.c.bf16 %v164_v32, %v164_v32 }
 0x13e   :  { %166 = vst [vmem:[#allocation2] sm:$0xf] %v165_v33 }
 0x145   :  { %v167_v34 = vld [vmem:[#allocation2] sm:$0xf] }
 0x146   :  { %240 = vmatmul.bf16.vlgmr.msra.gmra.mxu1 %v167_v34 }
 0x1c3   :  { %v241_v35 = vpop.f32.mrf.mxu1 }
 0x1c4   :  { %v242_v36 = vadd.f32 -4.6, %v241_v35 }
 0x1c6   :  { %v245_v37 = vpack.c.bf16 %v242_v36, %v242_v36 }
 0x1c8   :  { %246 = vst [vmem:[#allocation10] sm:$0xf] %v245_v37 }
 0x1c9   :  { %257 = dma.vmem_to_hbm [thread:$0]  %s253_s5, 64, %s255_s8, [#allocation6]  }
 0x1cb   :  { %v243_v38 = vpop.f32.mrf.mxu1 }
 0x1cc   :  { %454 = dma.done.wait [#allocation6], 64  }
 0x1cd   :  { %455 = vsyncadd [#allocation6], 4294967232 }
 0x1ce   :  { %262 = vsyncpa [#allocation5], 1 }
 0x1cf   :  { %263 = vsyncpa [#allocation8], 1 }
 0x1d0   :  { %264 = vsyncpa [#allocation6], 1 }

// kernel: tpu_custom_call.1
= control target key start
LH: loop header
LB: loop body
LE: loop exit
PB: predicated region body
PF: predicated region fallthrough
CT: control target
= control target key end

     0   :  { %9 = vsyncpa [#allocation5], 0  ;;  %s502_s0 = inlined_call_operand.hbm [shape: bf16[8,128], index: 0, kind: input, shape index: {}]   ;;  %s503_s1 = inlined_call_operand.hbm [shape: bf16[128,128], index: 1, kind: input, shape index: {}]   ;;  %s504_s2 = inlined_call_operand.vmem [shape: f32[1,128], index: 2, kind: input, shape index: {}]   ;;  %s505_s3 = inlined_call_operand.hbm [shape: bf16[128,128], index: 3, kind: input, shape index: {}]   ;;  %s506_s4 = inlined_call_operand.hbm [shape: bf16[8,16], index: 4, kind: output, shape index: {}]  }
   0x1   :  { %10 = vsyncpa [#allocation8], 0  ;;  %s27_s17 = sshll.u32 %s503_s1, 4  ;;  %s28_s17 = int_to_ptr.hbm [resolvable:$true] %s27_s17 }
   0x2   :  { %11 = vsyncpa [#allocation6], 0  ;;  %s456_s18 = smov [#allocation7]   ;;  %s17_s22 = sshll.u32 %s502_s0, 4  ;;  %s18_s22 = int_to_ptr.hbm [resolvable:$true] %s17_s22 }
   0x3   :  { %s29_s19 = sshll.u32 %s456_s18, 4  ;;  %s457_s23 = smov 64   ;;  %s30_s19 = int_to_ptr.vmem [resolvable:$true] %s29_s19 }
   0x4   :  { %s458_s24 = smov 4   ;;  %s459_s25 = smov [#allocation4]  }
   0x5   :  { %35 = dma.hbm_to_vmem [thread:$0]  %s28_s17, 1024, %s30_s19, [#allocation8], %s457_s23, %s457_s23, %s458_s24  }
   0x6   :  { %s19_s26 = sshll.u32 %s459_s25, 4  ;;  %s42_s29 = sshll.u32 %s505_s3, 4  ;;  %s20_s26 = int_to_ptr.vmem [resolvable:$true] %s19_s26  ;;  %s43_s29 = int_to_ptr.hbm [resolvable:$true] %s42_s29 }
   0x7   :  { %22 = dma.hbm_to_vmem [thread:$0]  %s18_s22, 64, %s20_s26, [#allocation5]  }
   0x8   :  { %s460_s1 = smov [#allocation9]  }
   0x9   :  { %s44_s30 = sshll.u32 %s460_s1, 4  ;;  %s45_s30 = int_to_ptr.vmem [resolvable:$true] %s44_s30 }
   0xa   :  { %50 = dma.hbm_to_vmem [thread:$0]  %s43_s29, 1024, %s45_s30, [#allocation8], %s457_s23, %s457_s23, %s458_s24  }
   0xb   :  { %450 = dma.done.wait [#allocation5], 64  }
   0xc   :  { %451 = vsyncadd [#allocation5], 4294967232 }
   0xd   :  { %452 = dma.done.wait [#allocation8], 2048  }
   0xe   :  { %453 = vsyncadd [#allocation8], 4294965248  ;;  %v336_v0 = vld [vmem:[#allocation7 + $0x38] sm:$0xff]  ;;  %v335_v1 = vld [vmem:[#allocation7 + $0x30] sm:$0xff]  ;;  %s254_s8 = sshll.u32 %s506_s4, 4  ;;  %s255_s8 = int_to_ptr.hbm [resolvable:$true] %s254_s8 }
   0xf   :  { %136 = vmatpush.bf16.msra.mxu0 %v336_v0  ;;  %v334_v2 = vld [vmem:[#allocation7 + $0x28] sm:$0xff]  ;;  %v333_v3 = vld [vmem:[#allocation7 + $0x20] sm:$0xff]  ;;  %v332_v4 = vld [vmem:[#allocation7 + $0x18] sm:$0xff] }
  0x10   :  { %v331_v5 = vld [vmem:[#allocation7 + $0x10] sm:$0xff]  ;;  %v330_v6 = vld [vmem:[#allocation7 + $0x8] sm:$0xff]  ;;  %v329_v7 = vld [vmem:[#allocation7] sm:$0xff] }
  0x11   :  { %v67_v8 = vld [vmem:[#allocation4] sm:$0xf]  ;;  %v351_v9 = vld [vmem:[%s504_s2] ss:$0 sm:$0xff]  ;;  %v343_v15 = vld [vmem:[#allocation9 + $0x30] sm:$0xff]  ;;  %s461_s2 = smov [#allocation10]  }
  0x12   :  { %v344_v14 = vld [vmem:[#allocation9 + $0x38] sm:$0xff]  ;;  %v342_v16 = vld [vmem:[#allocation9 + $0x28] sm:$0xff]  ;;  %v341_v17 = vld [vmem:[#allocation9 + $0x20] sm:$0xff]  ;;  %s252_s5 = sshll.u32 %s461_s2, 4  ;;  %s253_s5 = int_to_ptr.vmem [resolvable:$true] %s252_s5 }
  0x13   :  { %137 = vmatpush.bf16.msra.mxu0 %v335_v1  ;;  %232 = vmatpush.bf16.msra.mxu1 %v344_v14  ;;  %v340_v18 = vld [vmem:[#allocation9 + $0x18] sm:$0xff]  ;;  %v339_v19 = vld [vmem:[#allocation9 + $0x10] sm:$0xff]  ;;  %v338_v20 = vld [vmem:[#allocation9 + $0x8] sm:$0xff] }
  0x14   :  { %v337_v21 = vld [vmem:[#allocation9] sm:$0xff] }
  0x17   :  { %138 = vmatpush.bf16.msra.mxu0 %v334_v2  ;;  %233 = vmatpush.bf16.msra.mxu1 %v343_v15 }
  0x1b   :  { %139 = vmatpush.bf16.msra.mxu0 %v333_v3  ;;  %234 = vmatpush.bf16.msra.mxu1 %v342_v16 }
  0x1f   :  { %140 = vmatpush.bf16.msra.mxu0 %v332_v4  ;;  %235 = vmatpush.bf16.msra.mxu1 %v341_v17 }
  0x23   :  { %141 = vmatpush.bf16.msra.mxu0 %v331_v5  ;;  %236 = vmatpush.bf16.msra.mxu1 %v340_v18 }
  0x27   :  { %142 = vmatpush.bf16.msra.mxu0 %v330_v6  ;;  %237 = vmatpush.bf16.msra.mxu1 %v339_v19 }
  0x2b   :  { %143 = vmatpush.bf16.msra.mxu0 %v329_v7  ;;  %238 = vmatpush.bf16.msra.mxu1 %v338_v20 }
  0x2e   :  { %144 = vmatmul.bf16.vlgmr.msra.gmra.mxu0 %v67_v8 }
  0x2f   :  { %239 = vmatpush.bf16.msra.mxu1 %v337_v21 }
  0xab   :  { %v145_v10 = vpop.f32.mrf.mxu0 }
  0xac   :  { %v146_v11 = vadd.f32 %v351_v9, %v145_v10 }
  0xae   :  { %v149_v12 = vmul.f32 %v146_v11, %v146_v11 }
  0xb0   :  { %150 = vadd.xlane.f32.xlu0 %v149_v12 }
  0xb3   :  { %v147_v13 = vpop.f32.mrf.mxu0 }
 0x123   :  { %v151_v22 = vpop.xlane.xlu0 %150 }
 0x124   :  { %v152_v23 = vmax.f32 %v151_v22, 1e-24 }
 0x126   :  { %352 = vrsqrt.f32 %v152_v23  ;;  %vm159_vm1 = vweird.f32 %v152_v23 }
 0x12c   :  { %v353_v24 = vpop.eup %352 }
 0x12d   :  { %v154_v25 = vmul.f32 %v353_v24, %v152_v23  ;;  %vm160_vm0 = vweird.f32 %v353_v24 }
 0x12e   :  { %vm161_vm2 = vmor %vm159_vm1, %vm160_vm0 }
 0x12f   :  { %v155_v26 = vmul.f32 %v353_v24, %v154_v25 }
 0x131   :  { %v156_v27 = vmul.f32 0.5, %v155_v26 }
 0x133   :  { %v157_v28 = vsub.f32 1.5, %v156_v27 }
 0x135   :  { %v158_v29 = vmul.f32 %v353_v24, %v157_v28 }
 0x137   :  { %v162_v30 = vsel %vm161_vm2, %v353_v24, %v158_v29 }
 0x138   :  { %v163_v31 = vmul.f32 50.0, %v162_v30 }
 0x13a   :  { %v164_v32 = vmul.f32 %v163_v31, %v146_v11 }
 0x13c   :  { %v165_v33 = vpack.c.bf16 %v164_v32, %v164_v32 }
 0x13e   :  { %166 = vst [vmem:[#allocation2] sm:$0xf] %v165_v33 }
 0x145   :  { %v167_v34 = vld [vmem:[#allocation2] sm:$0xf] }
 0x146   :  { %240 = vmatmul.bf16.vlgmr.msra.gmra.mxu1 %v167_v34 }
 0x1c3   :  { %v241_v35 = vpop.f32.mrf.mxu1 }
 0x1c4   :  { %v242_v36 = vadd.f32 -4.6, %v241_v35 }
 0x1c6   :  { %v245_v37 = vpack.c.bf16 %v242_v36, %v242_v36 }
 0x1c8   :  { %246 = vst [vmem:[#allocation10] sm:$0xf] %v245_v37 }
 0x1c9   :  { %257 = dma.vmem_to_hbm [thread:$0]  %s253_s5, 64, %s255_s8, [#allocation6]  }
 0x1cb   :  { %v243_v38 = vpop.f32.mrf.mxu1 }
 0x1cc   :  { %454 = dma.done.wait [#allocation6], 64  }
 0x1cd   :  { %455 = vsyncadd [#allocation6], 4294967232 }
 0x1ce   :  { %262 = vsyncpa [#allocation5], 1 }
 0x1cf   :  { %263 = vsyncpa [#allocation8], 1 }
 0x1d0   :  { %264 = vsyncpa [#allocation6], 1 }

</bundles_post_ra>
